<compile_context>
chip_gen: v5e
topology: v5e:2x2
jax: 0.10.0
libtpu: 0.0.40
codegen_flags: <defaults>
</compile_context>

<pallas_src>
import numpy as np
import jax
import jax.numpy as jnp
from jax.experimental import pallas as pl
from jax.experimental.pallas import tpu as pltpu


_SRC_CHUNK = 32   # sublane chunk of the gather source (multiple of 8)


# ----------------------------------------------------------------------------- kernel

def _fused_index_kernel(rep_ref,      # SMEM (M,)          int32  scalar-prefetch: atoms/mol
                        src_ref,      # VMEM (1, BT)       int32  b2a[1:] bond tile
                        rev_ref,      # VMEM (1, BT)       int32  b2revb[1:] bond tile
                        b2a_ref,      # VMEM (NB1_pad, 1)  int32  full b2a (gather source)
                        eidx_ref,     # VMEM (2, BT)       int32  edge_index bond tile
                        batch_ref,    # VMEM (1, A_pad)    int32  molecule id per atom
                        ptr_ref):     # SMEM (M+1,)        int32  CSR pointer (Data.ptr)
    bt = rev_ref.shape[1]
    n_src = b2a_ref.shape[0]

    # ---- edge_index tile (every grid step) --------------------------------------
    # dst[m] = b2a[rev[m]] via a sublane-chunked one-hot accumulate: per chunk the
    # intermediate is only (_SRC_CHUNK, BT) int32 (a few vregs), never (NB+1, NB).
    rev = rev_ref[...]                                           # (1, BT)

    def gather_chunk(s, acc):
        base = pl.multiple_of(s * _SRC_CHUNK, _SRC_CHUNK)
        chunk = b2a_ref[pl.ds(base, _SRC_CHUNK), :]              # (C, 1)
        k = base + jax.lax.broadcasted_iota(jnp.int32, (_SRC_CHUNK, bt), 0)
        hit = rev == k                                           # (C, BT)
        return acc + jnp.sum(jnp.where(hit, chunk, 0), axis=0, keepdims=True)

    dst = jax.lax.fori_loop(0, n_src // _SRC_CHUNK, gather_chunk,
                            jnp.zeros((1, bt), jnp.int32))
    eidx_ref[0:1, :] = src_ref[...] - 1
    eidx_ref[1:2, :] = dst - 1

    # ---- batch / ptr (resident outputs; written once at the first grid step) ----
    @pl.when(pl.program_id(0) == 0)
    def _():
        n_mols = rep_ref.shape[0]
        batch_ref[...] = jnp.zeros_like(batch_ref)
        lane = jax.lax.broadcasted_iota(jnp.int32, batch_ref.shape, 1)
        ptr_ref[0] = jnp.int32(0)

        def body(i, off):
            n_i = rep_ref[i]                 # SMEM scalar read (free scalar slots)
            hi = off + n_i
            ptr_ref[i + 1] = hi              # ptr = cumsum(repeats) with leading 0
            # repeat_interleave: atoms [off, hi) belong to molecule i
            batch_ref[...] = jnp.where((lane >= off) & (lane < hi), i,
                                       batch_ref[...])
            return hi

        jax.lax.fori_loop(0, n_mols, body, jnp.int32(0))


# ----------------------------------------------------------------------------- wrapper

def _round_up(x, m):
    return ((x + m - 1) // m) * m


def build_graph_indices(b2a, b2revb, repeats, n_atoms):
    """edge_index (2, NB) int32, batch (A,) int32, ptr (M+1,) int32 — one fused call."""
    n_bonds = int(b2a.shape[0]) - 1
    n_mols = int(repeats.shape[0])

    nb_pad = _round_up(max(n_bonds, 1), 128)          # lane-dense bond axis
    bond_tile = min(512, nb_pad)                      # up to 512-lane tiles over bonds
    nb_pad = _round_up(nb_pad, bond_tile)
    nb1_pad = _round_up(n_bonds + 1, _SRC_CHUNK)      # gather source, sublane padded
    a_pad = _round_up(max(n_atoms, 1), 128)           # lane-dense atom axis

    b2a = b2a.astype(jnp.int32)
    b2revb = b2revb.astype(jnp.int32)
    src_row = jnp.pad(b2a[1:], (0, nb_pad - n_bonds)).reshape(1, nb_pad)
    rev_row = jnp.pad(b2revb[1:], (0, nb_pad - n_bonds)).reshape(1, nb_pad)
    b2a_col = jnp.pad(b2a, (0, nb1_pad - (n_bonds + 1))).reshape(nb1_pad, 1)
    rep = repeats.astype(jnp.int32)

    eidx, batch, ptr = pl.pallas_call(
        _fused_index_kernel,
        out_shape=(
            jax.ShapeDtypeStruct((2, nb_pad), jnp.int32),
            jax.ShapeDtypeStruct((1, a_pad), jnp.int32),
            jax.ShapeDtypeStruct((n_mols + 1,), jnp.int32),
        ),
        grid_spec=pltpu.PrefetchScalarGridSpec(
            num_scalar_prefetch=1,                     # repeats -> SMEM
            grid=(nb_pad // bond_tile,),               # tile the bond axis
            in_specs=[
                pl.BlockSpec((1, bond_tile), lambda t, _: (0, t)),
                pl.BlockSpec((1, bond_tile), lambda t, _: (0, t)),
                pl.BlockSpec((nb1_pad, 1), lambda t, _: (0, 0)),   # resident gather src
            ],
            out_specs=(
                pl.BlockSpec((2, bond_tile), lambda t, _: (0, t)),
                pl.BlockSpec((1, a_pad), lambda t, _: (0, 0)),      # resident across tiles
                pl.BlockSpec(memory_space=pltpu.MemorySpace.SMEM),  # ptr (scalar output)
            ),
        ),
        # batch/ptr are written only at step 0 and stay resident across the bond tiles,
        # so the single grid axis must be "arbitrary".  (If they were split out, the bond
        # axis could be marked "parallel" to shard across v7x's two TensorCores.)
        compiler_params=pltpu.CompilerParams(dimension_semantics=("arbitrary",)),
    )(rep, src_row, rev_row, b2a_col)

    return eidx[:, :n_bonds], batch[0, :n_atoms], ptr


def mol_graph2data_forward(f_atoms, f_bonds, w_atoms, w_bonds, a2b, b2a, b2revb,
                           a_scope, b_scope, degree_of_polym, distances,
                           node_paths, edge_paths, ctype):
    repeats = jnp.asarray([s[1] for s in a_scope], dtype=jnp.int32)
    n_atoms = int(sum(s[1] for s in a_scope))

    edge_index, batch, ptr = build_graph_indices(b2a, b2revb, repeats, n_atoms)

    # Row-0 (chemprop padding row) drops are pure HBM data movement; per the perf review
    # they are left to XLA slices (fused into the consumer) instead of standalone Pallas
    # copy kernels, and the 1-D weights are never reshaped into (N, 1) columns.
    f_atoms_out = f_atoms[1:, :]
    f_bonds_out = f_bonds[1:, :]
    w_atoms_out = w_atoms[1:]
    w_bonds_out = w_bonds[1:]

    b2revb_individual = []  # the reference loop never appends anything
    # TODO(synk): node_paths / edge_paths / distances are pure pass-through (device moves
    #             in torch); no compute to port.
    return (f_atoms_out, edge_index, f_bonds_out, w_atoms_out, w_bonds_out,
            b2revb_individual, distances, node_paths, edge_paths, batch, ptr)


# ----------------------------------------------------------------------------- main

if __name__ == "__main__":
    key = jax.random.PRNGKey(0)
    k1, k2, k3, k4, k5 = jax.random.split(key, 5)

    # synthetic BatchMolGraph components: 2 molecules, 5 + 3 atoms, 6 + 4 directed bonds
    atom_fdim, bond_fdim = 32, 16
    a_scope = [(1, 5), (6, 3)]
    b_scope = [(1, 6), (7, 4)]
    n_atoms = 8
    n_bonds = 10

    f_atoms = jax.random.normal(k1, (n_atoms + 1, atom_fdim), dtype=jnp.float32)
    f_bonds = jax.random.normal(k2, (n_bonds + 1, bond_fdim), dtype=jnp.float32)
    w_atoms = jax.random.uniform(k3, (n_atoms + 1,), dtype=jnp.float32)
    w_bonds = jax.random.uniform(k4, (n_bonds + 1,), dtype=jnp.float32)
    distances = jax.random.normal(k5, (n_atoms, n_atoms), dtype=jnp.float32)

    b2a = jnp.array([0, 1, 2, 2, 3, 4, 5, 6, 7, 7, 8], dtype=jnp.int32)
    b2revb = jnp.array([0, 2, 1, 4, 3, 6, 5, 8, 7, 10, 9], dtype=jnp.int32)
    a2b = None
    node_paths, edge_paths = None, None

    out = mol_graph2data_forward(f_atoms, f_bonds, w_atoms, w_bonds, a2b, b2a, b2revb,
                                 a_scope, b_scope, None, distances,
                                 node_paths, edge_paths, None)
    (f_atoms_o, edge_index, f_bonds_o, w_atoms_o, w_bonds_o,
     b2revb_individual, dists_o, _, _, batch, ptr) = out
    jax.block_until_ready((f_atoms_o, edge_index, f_bonds_o, w_atoms_o, w_bonds_o,
                           batch, ptr))

    # ---- reference check (numpy) ----
    b2a_np = np.asarray(b2a)
    b2revb_np = np.asarray(b2revb)
    ref_edge = np.stack([b2a_np[1:] - 1, b2a_np[b2revb_np[1:]] - 1]).astype(np.int32)
    ref_batch = np.concatenate([np.full(n, i) for i, (_, n) in enumerate(a_scope)]).astype(np.int32)
    ref_ptr = np.concatenate([[0], np.cumsum([n for _, n in a_scope])]).astype(np.int32)

    assert np.array_equal(np.asarray(edge_index), ref_edge)
    assert np.array_equal(np.asarray(batch), ref_batch)
    assert np.array_equal(np.asarray(ptr), ref_ptr)
    assert np.allclose(np.asarray(f_atoms_o), np.asarray(f_atoms)[1:, :])
    assert np.allclose(np.asarray(f_bonds_o), np.asarray(f_bonds)[1:, :])
    assert np.allclose(np.asarray(w_atoms_o), np.asarray(w_atoms)[1:])
    assert np.allclose(np.asarray(w_bonds_o), np.asarray(w_bonds)[1:])
    assert b2revb_individual == []

    print("KERNEL_OK")
</pallas_src>

<mosaic_0001>
module attributes {stable_mosaic.version = 11 : i64} {
  func.func @_fused_index_kernel(%arg0: i32, %arg1: memref<2xi32, #tpu.memory_space<smem>>, %arg2: memref<1x128xi32, #tpu.memory_space<vmem>>, %arg3: memref<1x128xi32, #tpu.memory_space<vmem>>, %arg4: memref<32x1xi32, #tpu.memory_space<vmem>>, %arg5: memref<2x128xi32, #tpu.memory_space<vmem>>, %arg6: memref<1x128xi32, #tpu.memory_space<vmem>>, %arg7: memref<3xi32, #tpu.memory_space<smem>>) attributes {dimension_semantics = [#tpu.dimension_semantics<arbitrary>], iteration_bounds = array<i64: 1>, scalar_prefetch = 1 : i64, scratch_operands = 0 : i64, tpu.core_type = #tpu.core_type<tc>, window_params = [{transform_indices = @transform_0, window_bounds = array<i64: 1, 128>}, {transform_indices = @transform_1, window_bounds = array<i64: 1, 128>}, {pipeline_mode = #tpu.pipeline_mode<synchronous>, transform_indices = @transform_2, window_bounds = array<i64: 32, 1>}, {transform_indices = @transform_3, window_bounds = array<i64: 2, 128>}, {pipeline_mode = #tpu.pipeline_mode<synchronous>, transform_indices = @transform_4, window_bounds = array<i64: 1, 128>}, {transform_indices = @transform_5, window_bounds = array<i64: 3>}]} {
    %c0 = arith.constant 0 : index
    %c0_0 = arith.constant 0 : index
    %0 = vector.load %arg3[%c0, %c0_0] : memref<1x128xi32, #tpu.memory_space<vmem>>, vector<1x128xi32>
    %c0_i32 = arith.constant 0 : i32
    %1 = vector.broadcast %c0_i32 : i32 to vector<1x128xi32>
    %c0_i32_1 = arith.constant 0 : i32
    %c32_i32 = arith.constant 32 : i32
    %2 = arith.muli %c0_i32_1, %c32_i32 : i32
    %3 = tpu.assume_multiple %2, 32 : i32
    %4 = arith.index_cast %3 : i32 to index
    %c0_2 = arith.constant 0 : index
    %5 = vector.load %arg4[%4, %c0_2] : memref<32x1xi32, #tpu.memory_space<vmem>>, vector<32x1xi32>
    %6 = tpu.iota {dimensions = array<i32: 0>} : vector<32x128xi32>
    %7 = vector.broadcast %3 : i32 to vector<32x128xi32>
    %8 = arith.addi %7, %6 : vector<32x128xi32>
    %9 = vector.broadcast %0 : vector<1x128xi32> to vector<32x128xi32>
    %10 = arith.cmpi eq, %9, %8 : vector<32x128xi32>
    %c0_i32_3 = arith.constant 0 : i32
    %11 = vector.shape_cast %5 : vector<32x1xi32> to vector<32x1xi32>
    %12 = vector.broadcast %11 : vector<32x1xi32> to vector<32x128xi32>
    %13 = vector.broadcast %c0_i32_3 : i32 to vector<32x128xi32>
    %14 = arith.select %10, %12, %13 : vector<32x128xi1>, vector<32x128xi32>
    %cst = arith.constant dense<0> : vector<128xi32>
    %15 = vector.multi_reduction <add>, %14, %cst [0] : vector<32x128xi32> to vector<128xi32>
    %16 = vector.shape_cast %15 : vector<128xi32> to vector<1x128xi32>
    %17 = arith.addi %1, %16 : vector<1x128xi32>
    %c1_i32 = arith.constant 1 : i32
    %c0_4 = arith.constant 0 : index
    %c0_5 = arith.constant 0 : index
    %18 = vector.load %arg2[%c0_4, %c0_5] : memref<1x128xi32, #tpu.memory_space<vmem>>, vector<1x128xi32>
    %c1_i32_6 = arith.constant 1 : i32
    %19 = vector.broadcast %c1_i32_6 : i32 to vector<1x128xi32>
    %20 = arith.subi %18, %19 : vector<1x128xi32>
    %c0_7 = arith.constant 0 : index
    %c0_8 = arith.constant 0 : index
    %21 = vector.load %arg5[%c0_7, %c0_8] : memref<2x128xi32, #tpu.memory_space<vmem>>, vector<1x128xi32>
    tpu.vector_store %arg5[%c0_7, %c0_8], %20 {strides = array<i32>} : memref<2x128xi32, #tpu.memory_space<vmem>>, vector<1x128xi32>,
    %c1_i32_9 = arith.constant 1 : i32
    %22 = vector.broadcast %c1_i32_9 : i32 to vector<1x128xi32>
    %23 = arith.subi %17, %22 : vector<1x128xi32>
    %c1 = arith.constant 1 : index
    %c0_10 = arith.constant 0 : index
    %24 = vector.load %arg5[%c1, %c0_10] : memref<2x128xi32, #tpu.memory_space<vmem>>, vector<1x128xi32>
    tpu.vector_store %arg5[%c1, %c0_10], %23 {strides = array<i32>} : memref<2x128xi32, #tpu.memory_space<vmem>>, vector<1x128xi32>,
    %c0_i32_11 = arith.constant 0 : i32
    %25 = arith.cmpi eq, %arg0, %c0_i32_11 : i32
    %26 = arith.extui %25 : i1 to i32
    %c0_i32_12 = arith.constant 0 : i32
    %27 = arith.cmpi ne, %26, %c0_i32_12 : i32
    scf.if %27 {
      %c0_i32_13 = arith.constant 0 : i32
      %28 = vector.broadcast %c0_i32_13 : i32 to vector<1x128xi32>
      %c0_14 = arith.constant 0 : index
      %c0_15 = arith.constant 0 : index
      %29 = vector.load %arg6[%c0_14, %c0_15] : memref<1x128xi32, #tpu.memory_space<vmem>>, vector<1x128xi32>
      tpu.vector_store %arg6[%c0_14, %c0_15], %28 {strides = array<i32>} : memref<1x128xi32, #tpu.memory_space<vmem>>, vector<1x128xi32>,
      %30 = tpu.iota {dimensions = array<i32: 1>} : vector<1x128xi32>
      %c0_i32_16 = arith.constant 0 : i32
      %c0_17 = arith.constant 0 : index
      %31 = memref.load %arg7[%c0_17] : memref<3xi32, #tpu.memory_space<smem>>
      memref.store %c0_i32_16, %arg7[%c0_17] : memref<3xi32, #tpu.memory_space<smem>>
      %c0_i32_18 = arith.constant 0 : i32
      %c0_i32_19 = arith.constant 0 : i32
      %c2_i32 = arith.constant 2 : i32
      %32 = arith.addi %c0_i32_19, %c2_i32 : i32
      %c1_i32_20 = arith.constant 1 : i32
      %33 = scf.for %arg8 = %c0_i32_19 to %32 step %c1_i32_20 iter_args(%arg9 = %c0_i32_18) -> (i32)  : i32 {
        %34 = arith.index_cast %arg8 : i32 to index
        %35 = memref.load %arg1[%34] : memref<2xi32, #tpu.memory_space<smem>>
        %36 = arith.addi %arg9, %35 : i32
        %c1_i32_22 = arith.constant 1 : i32
        %37 = arith.addi %arg8, %c1_i32_22 : i32
        %38 = arith.index_cast %37 : i32 to index
        %39 = memref.load %arg7[%38] : memref<3xi32, #tpu.memory_space<smem>>
        memref.store %36, %arg7[%38] : memref<3xi32, #tpu.memory_space<smem>>
        %40 = vector.broadcast %arg9 : i32 to vector<1x128xi32>
        %41 = arith.cmpi sge, %30, %40 : vector<1x128xi32>
        %42 = vector.broadcast %36 : i32 to vector<1x128xi32>
        %43 = arith.cmpi slt, %30, %42 : vector<1x128xi32>
        %44 = arith.andi %41, %43 : vector<1x128xi1>
        %c0_23 = arith.constant 0 : index
        %c0_24 = arith.constant 0 : index
        %45 = vector.load %arg6[%c0_23, %c0_24] : memref<1x128xi32, #tpu.memory_space<vmem>>, vector<1x128xi32>
        %46 = vector.broadcast %arg8 : i32 to vector<1x128xi32>
        %47 = arith.select %44, %46, %45 : vector<1x128xi1>, vector<1x128xi32>
        %c0_25 = arith.constant 0 : index
        %c0_26 = arith.constant 0 : index
        %48 = vector.load %arg6[%c0_25, %c0_26] : memref<1x128xi32, #tpu.memory_space<vmem>>, vector<1x128xi32>
        tpu.vector_store %arg6[%c0_25, %c0_26], %47 {strides = array<i32>} : memref<1x128xi32, #tpu.memory_space<vmem>>, vector<1x128xi32>,
        scf.yield %36 : i32
      }
      %c2_i32_21 = arith.constant 2 : i32
    } else {
    }
    return
  }
  func.func @transform_0(%arg0: i32, %arg1: memref<2xi32, #tpu.memory_space<smem>>) -> (i32, i32) {
    %c0_i32 = arith.constant 0 : i32
    %c0_i32_0 = arith.constant 0 : i32
    return %c0_i32, %arg0 : i32, i32
  }
  func.func @transform_1(%arg0: i32, %arg1: memref<2xi32, #tpu.memory_space<smem>>) -> (i32, i32) {
    %c0_i32 = arith.constant 0 : i32
    %c0_i32_0 = arith.constant 0 : i32
    return %c0_i32, %arg0 : i32, i32
  }
  func.func @transform_2(%arg0: i32, %arg1: memref<2xi32, #tpu.memory_space<smem>>) -> (i32, i32) {
    %c0_i32 = arith.constant 0 : i32
    %c0_i32_0 = arith.constant 0 : i32
    %c0_i32_1 = arith.constant 0 : i32
    return %c0_i32, %c0_i32_0 : i32, i32
  }
  func.func @transform_3(%arg0: i32, %arg1: memref<2xi32, #tpu.memory_space<smem>>) -> (i32, i32) {
    %c0_i32 = arith.constant 0 : i32
    %c0_i32_0 = arith.constant 0 : i32
    return %c0_i32, %arg0 : i32, i32
  }
  func.func @transform_4(%arg0: i32, %arg1: memref<2xi32, #tpu.memory_space<smem>>) -> (i32, i32) {
    %c0_i32 = arith.constant 0 : i32
    %c0_i32_0 = arith.constant 0 : i32
    %c0_i32_1 = arith.constant 0 : i32
    return %c0_i32, %c0_i32_0 : i32, i32
  }
  func.func @transform_5(%arg0: i32, %arg1: memref<2xi32, #tpu.memory_space<smem>>) -> i32 {
    %c0_i32 = arith.constant 0 : i32
    %c0_i32_0 = arith.constant 0 : i32
    return %c0_i32 : i32
  }
}

</mosaic_0001>

<bundles_post_ra>
// kernel: tpu_custom_call.1
= control target key start
LH: loop header
LB: loop body
LE: loop exit
PB: predicated region body
PF: predicated region fallthrough
CT: control target
= control target key end

     0   :  { %s289_s24 = smov [#allocation3]   ;;  %s364_s0 = inlined_call_operand.vmem [shape: s32[2], index: 0, kind: input, shape index: {}]   ;;  %s365_s1 = inlined_call_operand.vmem [shape: s32[1,128], index: 1, kind: input, shape index: {}]   ;;  %s366_s2 = inlined_call_operand.vmem [shape: s32[1,128], index: 2, kind: input, shape index: {}]   ;;  %s367_s3 = inlined_call_operand.vmem [shape: s32[32,1], index: 3, kind: input, shape index: {}]   ;;  %s368_s4 = inlined_call_operand.hbm [shape: s32[2,128], index: 4, kind: output, shape index: {0}]   ;;  %s369_s5 = inlined_call_operand.hbm [shape: s32[1,128], index: 5, kind: output, shape index: {1}]   ;;  %s370_s6 = inlined_call_operand.hbm [shape: s32[3], index: 6, kind: output, shape index: {2}]  }
   0x1   :  { %s13_s23 = sshll.u32 %s364_s0, 4  ;;  %s14_s23 = int_to_ptr.vmem [resolvable:$true] %s13_s23 }
   0x2   :  { %16 = dma.vmem_to_smem %s14_s23, 16, %s289_s24, [#allocation2] }
   0x3   :  { %273 = dma.done.wait [#allocation2], 16 }
   0x4   :  { %274 = vsyncadd [#allocation2], 4294967280 }
   0x5   :  { %19 = sfence }
   0x6   :  { %20 = vsyncpa [#allocation5], 0 }
   0x7   :  { %21 = vsyncpa [#allocation8], 0  ;;  %v32_v0 = vld [vmem:[%s367_s3 + $0x10] sm:$0xff]  ;;  %v30_v1 = vld [vmem:[%s367_s3] sm:$0xff]  ;;  %v34_v2 = vlaneseq  ;;  %v290_v3 = vmov 0  }
   0x8   :  { %191 = vset.pattern.permute.xlu1 %v290_v3  ;;  %83 = vst [vmem:[#allocation7] sm:$0x1] %v290_v3  ;;  %190 = vset.pattern.permute.xlu0 %v290_v3 }
   0x9   :  { %56 = vperm.xlu1 %191, %v32_v0   ;;  %50 = vperm.xlu0 %190, %v30_v1   ;;  %v339_v4 = vand.u32 127, %v34_v2 }
   0xa   :  { %22 = vsyncpa [#allocation6], 0  ;;  %v33_v5 = vld [vmem:[%s367_s3 + $0x18] sm:$0xff]  ;;  %v31_v6 = vld [vmem:[%s367_s3 + $0x8] sm:$0xff]  ;;  %s291_s8 = smov 0   ;;  %v35_v9 = vshrl.u32 %v34_v2, 7 }
   0xb   :  { %87 = sst [smem:[#allocation9]] %s291_s8  ;;  %v74_v7 = vld [vmem:[%s365_s1] sm:$0x1]  ;;  %s281_s1 = smov 0  }
   0xc   :  { %v166_v8 = vadd.s32 4294967295, %v74_v7  ;;  %v37_v12 = vadd.s32 16, %v35_v9  ;;  %v192_v13 = vld [vmem:[%s366_s2] ss:$0 sm:$0xff]  ;;  %v38_v14 = vadd.s32 24, %v35_v9  ;;  %v36_v15 = vadd.s32 8, %v35_v9 }
   0xd   :  { %vm45_vm1 = vcmp.eq.s32.totalorder %v192_v13, %v35_v9  ;;  %s285_s2 = smov 0  }
   0xe   :  { %76 = vst [vmem:[#allocation4] sm:$0x1] %v166_v8  ;;  %vm47_vm0 = vcmp.eq.s32.totalorder %v192_v13, %v37_v12  ;;  %vm48_vm2 = vcmp.eq.s32.totalorder %v192_v13, %v38_v14  ;;  %vm46_vm3 = vcmp.eq.s32.totalorder %v192_v13, %v36_v15 }
  0x11   :  { %59 = vperm.xlu1 %191, %v33_v5   ;;  %53 = vperm.xlu0 %190, %v31_v6  }
  0x7b   :  { %v57_v10 = vpop.permute.xlu1 %56  ;;  %v51_v11 = vpop.permute.xlu0 %50 }
  0x7c   :  { %v63_v18 = vsel %vm47_vm0, %v57_v10, 0  ;;  %v61_v19 = vsel %vm45_vm1, %v51_v11, 0 }
  0x83   :  { %v60_v16 = vpop.permute.xlu1 %59  ;;  %v54_v17 = vpop.permute.xlu0 %53 }
  0x84   :  { %v64_v20 = vsel %vm48_vm2, %v60_v16, 0  ;;  %v62_v21 = vsel %vm46_vm3, %v54_v17, 0 }
  0x85   :  { %v66_v22 = vadd.s32 %v64_v20, %v63_v18  ;;  %v65_v23 = vadd.s32 %v62_v21, %v61_v19 }
  0x87   :  { %v67_v24 = vadd.s32 %v66_v22, %v65_v23 }
  0x89   :  { %v68_v25 = vrot.slane %v67_v24, 4 }
  0x8b   :  { %v69_v26 = vadd.s32 %v68_v25, %v67_v24 }
  0x8d   :  { %v70_v27 = vrot.slane %v69_v26, 2 }
  0x8f   :  { %v71_v28 = vadd.s32 %v70_v27, %v69_v26 }
  0x91   :  { %v72_v29 = vrot.slane %v71_v28, 1 }
  0x93   :  { %v73_v30 = vadd.s32 %v72_v29, %v71_v28 }
  0x95   :  { %v167_v31 = vadd.s32 4294967295, %v73_v30 }
  0x97   :  { %78 = vst [vmem:[#allocation4 + $0x1] sm:$0x1] %v167_v31 }
  0x98 LB: > { %s95_s3 = sld [smem:[#allocation3 + %s287_s2]]  ;;  %v100_v32 = vstv %s283_s1  ;;  %s156_s13 = scalar_lea.smem [#allocation9], %s287_s2  ;;  %v105_v34 = vld [vmem:[#allocation7] sm:$0x1]  ;;  %v106_v35 = vstv %s287_s2  ;;  %s287_s2 = sphi %s285_s2, %s93_s2   ;;  %s283_s1 = sphi %s281_s1, %s96_s1  }
  0x99   : > { %s157_s14 = scalar_lea.smem %s156_s13, 1 [#allocation9]  ;;  %vm101_vm4 = vcmp.ge.s32.totalorder %v339_v4, %v100_v32  ;;  %s93_s2 = sadd.s32 1, %s287_s2  }
  0x9a   : > { %p90_p0 = scmp.ge.s32.totalorder %s93_s2, 2  }
  0x9b   :  { %s116_s17 = sshll.u32 (%p90_p0), %s368_s4, 4  ;;  %s292_s18 = smov (%p90_p0), [#allocation4]   ;;  %s117_s17 = int_to_ptr.hbm [resolvable:$true] %s116_s17 }
  0x9c   :  { %s114_s19 = sshll.u32 (%p90_p0), %s292_s18, 4  ;;  %s293_s20 = smov (%p90_p0), [#allocation7]   ;;  %s115_s19 = int_to_ptr.vmem [resolvable:$true] %s114_s19 }
  0x9d   :  { %119 = dma.vmem_to_hbm [thread:$0]  (%p90_p0), %s115_s19, 32, %s117_s17, [#allocation5]  }
  0x9e   : > { %s96_s1 = sadd.s32 %s283_s1, %s95_s3   ;;  %s125_s21 = sshll.u32 (%p90_p0), %s293_s20, 4  ;;  %s126_s21 = int_to_ptr.vmem [resolvable:$true] %s125_s21 }
  0x9f   : > { %99 = sst [smem:[%s157_s14]] %s96_s1  ;;  %v102_v33 = vstv %s96_s1  ;;  %92 = sbr.rel (!%p90_p0) target bundleno = 152 (0x98), region = 61 }
  0xa0   : > { %vm103_vm5 = vcmp.lt.s32.totalorder %v339_v4, %v102_v33  ;;  %s127_s24 = sshll.u32 (%p90_p0), %s369_s5, 4  ;;  %s136_s27 = sshll.u32 (%p90_p0), %s370_s6, 4  ;;  %s128_s24 = int_to_ptr.hbm [resolvable:$true] %s127_s24  ;;  %s137_s27 = int_to_ptr.hbm [resolvable:$true] %s136_s27 }
  0xa1   : > { %vm104_vm6 = vmand %vm101_vm4, %vm103_vm5  ;;  %s294_s4 = smov (%p90_p0), [#allocation9]  }
  0xa2   : > { %v107_v36 = vsel %vm104_vm6, %v106_v35, %v105_v34  ;;  %139 = dma.smem_to_hbm (%p90_p0), %s294_s4, 16, %s137_s27, [#allocation6]  }
  0xa3   : > { %108 = vst [vmem:[#allocation7] sm:$0x1] %v107_v36 }
  0xa4   :  { %130 = dma.vmem_to_hbm [thread:$0]  %s126_s21, 16, %s128_s24, [#allocation8]  }
  0xa5   :  { %275 = dma.done.wait [#allocation5], 32  }
  0xa6   :  { %276 = vsyncadd [#allocation5], 4294967264 }
  0xa7   :  { %277 = dma.done.wait [#allocation8], 16  }
  0xa8   :  { %278 = vsyncadd [#allocation8], 4294967280 }
  0xa9   :  { %279 = dma.done.wait [#allocation6], 16  }
  0xaa   :  { %280 = vsyncadd [#allocation6], 4294967280 }
  0xab   :  { %152 = sfence }
  0xac   :  { %153 = vsyncpa [#allocation5], 1 }
  0xad   :  { %154 = vsyncpa [#allocation8], 1 }
  0xae   :  { %155 = vsyncpa [#allocation6], 1 }

</bundles_post_ra>
